<compile_context>
chip_gen: v7x
topology: tpu7x:2x2x1
jax: 0.10.0
libtpu: 0.0.40
codegen_flags: <defaults>
</compile_context>

<pallas_src>
import functools

import jax
import jax.numpy as jnp
from jax import lax
from jax.experimental import pallas as pl
from jax.experimental.pallas import tpu as pltpu


# --------------------------------------------------------------------------
# Kernels
# --------------------------------------------------------------------------
def _cutmix_pixel_kernel(mask_ref, x_ref, xr_ref, out_ref):
    # mask_ref : VMEM (1, 1, thw) int32   -- 1 inside the cutmix box, else 0
    # x_ref    : VMEM (1, C, thw) <dtype> -- original batch tile
    # xr_ref   : VMEM (1, C, thw) <dtype> -- "rolled" batch tile (via index_map)
    # out_ref  : VMEM (1, C, thw) <dtype>
    in_box = mask_ref[...] != 0                       # (1, 1, thw) bool
    out_ref[...] = jnp.where(in_box, xr_ref[...], x_ref[...])


def _target_mix_kernel(lam_ref, t_ref, tr_ref, out_ref, *, num_classes):
    # lam_ref : SMEM (1,) float32  -- adjusted lambda (1.0 => "no cutmix")
    # t_ref   : VMEM (B, 1) int32  -- target
    # tr_ref  : VMEM (B, 1) int32  -- target rolled by 1 along dim 0
    # out_ref : VMEM (B, num_classes) <dtype>
    lam = lam_ref[0]
    b = t_ref.shape[0]
    cls = lax.broadcasted_iota(jnp.int32, (b, num_classes), 1)
    oh = (cls == t_ref[...]).astype(jnp.float32)       # (B, NC)
    oh_r = (cls == tr_ref[...]).astype(jnp.float32)    # (B, NC)
    out_ref[...] = (lam * oh + (1.0 - lam) * oh_r).astype(out_ref.dtype)


# --------------------------------------------------------------------------
# Wrapper
# --------------------------------------------------------------------------
def _choose_hw_tile(hw, c, itemsize):
    """Pick a lane-dense tile over H*W keeping each (1, C, thw) VMEM buffer
    ~<=1 MiB after sublane padding, so 3 arrays x 2 buffers + mask stay well
    under the scoped-VMEM defaults on every generation (incl. v7x)."""
    padded_c = ((c + 7) // 8) * 8
    budget = 1 << 20
    max_thw = max(budget // (padded_c * itemsize), 128)
    if hw <= max_thw:
        return hw                       # full spatial extent (legal block dim)
    return max((max_thw // 128) * 128, 128)


def random_cutmix(batch, target, key, *, num_classes, p=0.5, alpha=1.0):
    """JAX/Pallas equivalent of RandomCutmix.forward.

    Returns (mixed_batch: (B,C,H,W) batch.dtype,
             mixed_target: (B,num_classes) batch.dtype).
    """
    assert batch.ndim == 4, "Batch ndim should be 4."
    assert target.ndim == 1, "Target ndim should be 1."
    B, C, H, W = batch.shape
    HW = H * W
    dtype = batch.dtype
    itemsize = jnp.dtype(dtype).itemsize

    # ---- scalar glue: coin flip, lambda ~ Beta(alpha, alpha), random box ----
    k_p, k_lam, k_rx, k_ry = jax.random.split(key, 4)

    u = jax.random.uniform(k_p, (), jnp.float32)
    apply_mix = u < p                                   # torch.rand(1) < p

    lam0 = jax.random.beta(k_lam, alpha, alpha).astype(jnp.float32)

    r_x = jax.random.randint(k_rx, (), 0, W, jnp.int32)
    r_y = jax.random.randint(k_ry, (), 0, H, jnp.int32)

    r = 0.5 * jnp.sqrt(1.0 - lam0)
    r_w_half = jnp.floor(r * W).astype(jnp.int32)
    r_h_half = jnp.floor(r * H).astype(jnp.int32)

    x1 = jnp.maximum(r_x - r_w_half, 0)
    y1 = jnp.maximum(r_y - r_h_half, 0)
    x2 = jnp.minimum(r_x + r_w_half, W)
    y2 = jnp.minimum(r_y + r_h_half, H)

    # adjusted lambda from the actual clipped box area
    lam_adj = 1.0 - ((x2 - x1) * (y2 - y1)).astype(jnp.float32) / float(W * H)

    # Fold the p-branch: empty box + lam = 1.0 == "no transform".
    zero = jnp.int32(0)
    y1 = jnp.where(apply_mix, y1, zero)
    y2 = jnp.where(apply_mix, y2, zero)
    x1 = jnp.where(apply_mix, x1, zero)
    x2 = jnp.where(apply_mix, x2, zero)
    lam_final = jnp.where(apply_mix, lam_adj, jnp.float32(1.0))

    # ---- tiny spatial box mask, built once in plain JAX (H*W elements) ----
    rows = lax.broadcasted_iota(jnp.int32, (H, W), 0)
    cols = lax.broadcasted_iota(jnp.int32, (H, W), 1)
    in_box = (rows >= y1) & (rows < y2) & (cols >= x1) & (cols < x2)
    mask = in_box.astype(jnp.int32).reshape(1, 1, HW)

    # ---- pixel kernel: gridded, lane-dense, no rolled-batch materialization ----
    batch3 = batch.reshape(B, C, HW)                    # free reshape
    thw = _choose_hw_tile(HW, C, itemsize)
    n_t = pl.cdiv(HW, thw)

    # grid order (tile, batch): batch innermost => the mask block index is
    # constant across the inner axis and is not re-fetched every step.
    pixel_call = pl.pallas_call(
        _cutmix_pixel_kernel,
        grid=(n_t, B),
        in_specs=[
            pl.BlockSpec((1, 1, thw), lambda t, b: (0, 0, t)),          # mask
            pl.BlockSpec((1, C, thw), lambda t, b: (b, 0, t)),          # batch
            pl.BlockSpec((1, C, thw),
                         lambda t, b: ((b + B - 1) % B, 0, t)),         # rolled view
        ],
        out_specs=pl.BlockSpec((1, C, thw), lambda t, b: (b, 0, t)),
        out_shape=jax.ShapeDtypeStruct((B, C, HW), dtype),
        compiler_params=pltpu.CompilerParams(
            dimension_semantics=("parallel", "parallel")),
    )
    # TODO(synk): optional further win -- alias output to input and skip tiles
    # that don't intersect the box (traffic ~ box area instead of full batch).
    out_img = pixel_call(mask, batch3, batch3).reshape(B, C, H, W)

    # ---- target mixing: tiny, decoupled pallas_call ----
    lam_arr = lam_final.reshape(1).astype(jnp.float32)
    t2 = target.astype(jnp.int32).reshape(B, 1)
    tr2 = jnp.roll(target, 1, axis=0).astype(jnp.int32).reshape(B, 1)

    tgt_call = pl.pallas_call(
        functools.partial(_target_mix_kernel, num_classes=num_classes),
        out_shape=jax.ShapeDtypeStruct((B, num_classes), dtype),
        in_specs=[
            pl.BlockSpec(memory_space=pltpu.MemorySpace.SMEM),   # lam
            pl.BlockSpec(memory_space=pltpu.MemorySpace.VMEM),   # target
            pl.BlockSpec(memory_space=pltpu.MemorySpace.VMEM),   # target rolled
        ],
        out_specs=pl.BlockSpec(memory_space=pltpu.MemorySpace.VMEM),
    )
    out_tgt = tgt_call(lam_arr, t2, tr2)

    return out_img, out_tgt


# --------------------------------------------------------------------------
# Self-test
# --------------------------------------------------------------------------
if __name__ == "__main__":
    num_classes = 10
    B, C, H, W = 2, 4, 16, 16

    root = jax.random.PRNGKey(0)
    k_batch, k_tgt, k_mix = jax.random.split(root, 3)

    batch = jax.random.normal(k_batch, (B, C, H, W), jnp.float32)
    target = jax.random.randint(k_tgt, (B,), 0, num_classes, jnp.int32)

    fn = jax.jit(functools.partial(random_cutmix, num_classes=num_classes,
                                   p=0.5, alpha=1.0))
    out_img, out_tgt = fn(batch, target, k_mix)
    jax.block_until_ready((out_img, out_tgt))

    assert out_img.shape == (B, C, H, W)
    assert out_img.dtype == batch.dtype
    assert out_tgt.shape == (B, num_classes)
    # target rows are convex combinations of one-hots -> rows sum to 1
    assert jnp.allclose(out_tgt.sum(axis=-1), 1.0, atol=1e-5)
    # every output pixel is either the original or the rolled pixel
    rolled = jnp.roll(batch, 1, axis=0)
    same = jnp.isclose(out_img, batch) | jnp.isclose(out_img, rolled)
    assert bool(same.all())

    print("KERNEL_OK")
</pallas_src>

<mosaic_0001>
module attributes {stable_mosaic.version = 11 : i64} {
  func.func @_target_mix_kernel(%arg0: memref<1xf32, #tpu.memory_space<smem>>, %arg1: memref<2x1xi32, #tpu.memory_space<vmem>>, %arg2: memref<2x1xi32, #tpu.memory_space<vmem>>, %arg3: memref<2x10xf32, #tpu.memory_space<vmem>>) attributes {dimension_semantics = [], scalar_prefetch = 0 : i64, scratch_operands = 0 : i64, tpu.core_type = #tpu.core_type<tc>} {
    %c0 = arith.constant 0 : index
    %0 = memref.load %arg0[%c0] : memref<1xf32, #tpu.memory_space<smem>>
    %1 = tpu.iota {dimensions = array<i32: 1>} : vector<2x10xi32>
    %c0_0 = arith.constant 0 : index
    %c0_1 = arith.constant 0 : index
    %2 = vector.load %arg1[%c0_0, %c0_1] : memref<2x1xi32, #tpu.memory_space<vmem>>, vector<2x1xi32>
    %3 = vector.broadcast %2 : vector<2x1xi32> to vector<2x10xi32>
    %4 = arith.cmpi eq, %1, %3 : vector<2x10xi32>
    %5 = arith.extui %4 : vector<2x10xi1> to vector<2x10xi32>
    %6 = arith.sitofp %5 : vector<2x10xi32> to vector<2x10xf32>
    %c0_2 = arith.constant 0 : index
    %c0_3 = arith.constant 0 : index
    %7 = vector.load %arg2[%c0_2, %c0_3] : memref<2x1xi32, #tpu.memory_space<vmem>>, vector<2x1xi32>
    %8 = vector.broadcast %7 : vector<2x1xi32> to vector<2x10xi32>
    %9 = arith.cmpi eq, %1, %8 : vector<2x10xi32>
    %10 = arith.extui %9 : vector<2x10xi1> to vector<2x10xi32>
    %11 = arith.sitofp %10 : vector<2x10xi32> to vector<2x10xf32>
    %12 = vector.broadcast %0 : f32 to vector<2x10xf32>
    %13 = arith.mulf %12, %6 : vector<2x10xf32>
    %cst = arith.constant 1.000000e+00 : f32
    %14 = arith.subf %cst, %0 : f32
    %15 = vector.broadcast %14 : f32 to vector<2x10xf32>
    %16 = arith.mulf %15, %11 : vector<2x10xf32>
    %17 = arith.addf %13, %16 : vector<2x10xf32>
    %c0_4 = arith.constant 0 : index
    %c0_5 = arith.constant 0 : index
    %18 = vector.load %arg3[%c0_4, %c0_5] : memref<2x10xf32, #tpu.memory_space<vmem>>, vector<2x10xf32>
    tpu.vector_store %arg3[%c0_4, %c0_5], %17 {strides = array<i32>} : memref<2x10xf32, #tpu.memory_space<vmem>>, vector<2x10xf32>,
    return
  }
}

module attributes {stable_mosaic.version = 11 : i64} {
  func.func @_cutmix_pixel_kernel(%arg0: i32, %arg1: i32, %arg2: memref<1x1x256xi32, #tpu.memory_space<vmem>>, %arg3: memref<1x4x256xf32, #tpu.memory_space<vmem>>, %arg4: memref<1x4x256xf32, #tpu.memory_space<vmem>>, %arg5: memref<1x4x256xf32, #tpu.memory_space<vmem>>) attributes {dimension_semantics = [#tpu.dimension_semantics<parallel>, #tpu.dimension_semantics<parallel>], iteration_bounds = array<i64: 1, 2>, scalar_prefetch = 0 : i64, scratch_operands = 0 : i64, tpu.core_type = #tpu.core_type<tc>, window_params = [{transform_indices = @transform_0, window_bounds = array<i64: 1, 1, 256>}, {transform_indices = @transform_1, window_bounds = array<i64: 1, 4, 256>}, {transform_indices = @transform_2, window_bounds = array<i64: 1, 4, 256>}, {transform_indices = @transform_3, window_bounds = array<i64: 1, 4, 256>}]} {
    %c0 = arith.constant 0 : index
    %c0_0 = arith.constant 0 : index
    %c0_1 = arith.constant 0 : index
    %0 = vector.load %arg2[%c0, %c0_0, %c0_1] : memref<1x1x256xi32, #tpu.memory_space<vmem>>, vector<1x1x256xi32>
    %c0_i32 = arith.constant 0 : i32
    %1 = vector.broadcast %c0_i32 : i32 to vector<1x1x256xi32>
    %2 = arith.cmpi ne, %0, %1 : vector<1x1x256xi32>
    %c0_2 = arith.constant 0 : index
    %c0_3 = arith.constant 0 : index
    %c0_4 = arith.constant 0 : index
    %3 = vector.load %arg4[%c0_2, %c0_3, %c0_4] : memref<1x4x256xf32, #tpu.memory_space<vmem>>, vector<1x4x256xf32>
    %c0_5 = arith.constant 0 : index
    %c0_6 = arith.constant 0 : index
    %c0_7 = arith.constant 0 : index
    %4 = vector.load %arg3[%c0_5, %c0_6, %c0_7] : memref<1x4x256xf32, #tpu.memory_space<vmem>>, vector<1x4x256xf32>
    %5 = vector.shape_cast %2 : vector<1x1x256xi1> to vector<1x1x256xi1>
    %6 = vector.broadcast %5 : vector<1x1x256xi1> to vector<1x4x256xi1>
    %7 = arith.select %6, %3, %4 : vector<1x4x256xi1>, vector<1x4x256xf32>
    %c0_8 = arith.constant 0 : index
    %c0_9 = arith.constant 0 : index
    %c0_10 = arith.constant 0 : index
    %8 = vector.load %arg5[%c0_8, %c0_9, %c0_10] : memref<1x4x256xf32, #tpu.memory_space<vmem>>, vector<1x4x256xf32>
    tpu.vector_store %arg5[%c0_8, %c0_9, %c0_10], %7 {strides = array<i32>} : memref<1x4x256xf32, #tpu.memory_space<vmem>>, vector<1x4x256xf32>,
    return
  }
  func.func @transform_0(%arg0: i32, %arg1: i32) -> (i32, i32, i32) {
    %c0_i32 = arith.constant 0 : i32
    %c0_i32_0 = arith.constant 0 : i32
    %c0_i32_1 = arith.constant 0 : i32
    return %c0_i32, %c0_i32_0, %arg0 : i32, i32, i32
  }
  func.func @transform_1(%arg0: i32, %arg1: i32) -> (i32, i32, i32) {
    %c0_i32 = arith.constant 0 : i32
    %c0_i32_0 = arith.constant 0 : i32
    return %arg1, %c0_i32, %arg0 : i32, i32, i32
  }
  func.func @transform_2(%arg0: i32, %arg1: i32) -> (i32, i32, i32) {
    %c2_i32 = arith.constant 2 : i32
    %0 = arith.addi %arg1, %c2_i32 : i32
    %c1_i32 = arith.constant 1 : i32
    %1 = arith.subi %0, %c1_i32 : i32
    %c2_i32_0 = arith.constant 2 : i32
    %c0_i32 = arith.constant 0 : i32
    %2 = arith.cmpi eq, %c2_i32_0, %c0_i32 : i32
    %c1_i32_1 = arith.constant 1 : i32
    %3 = arith.select %2, %c1_i32_1, %c2_i32_0 : i32
    %4 = arith.remsi %1, %3 : i32
    %c0_i32_2 = arith.constant 0 : i32
    %5 = arith.cmpi ne, %4, %c0_i32_2 : i32
    %c0_i32_3 = arith.constant 0 : i32
    %6 = arith.cmpi slt, %4, %c0_i32_3 : i32
    %c0_i32_4 = arith.constant 0 : i32
    %7 = arith.cmpi slt, %3, %c0_i32_4 : i32
    %8 = arith.xori %6, %7 : i1
    %9 = arith.andi %8, %5 : i1
    %10 = arith.addi %4, %3 : i32
    %11 = arith.select %9, %10, %4 : i32
    %c0_i32_5 = arith.constant 0 : i32
    %c0_i32_6 = arith.constant 0 : i32
    return %11, %c0_i32_5, %arg0 : i32, i32, i32
  }
  func.func @transform_3(%arg0: i32, %arg1: i32) -> (i32, i32, i32) {
    %c0_i32 = arith.constant 0 : i32
    %c0_i32_0 = arith.constant 0 : i32
    return %arg1, %c0_i32, %arg0 : i32, i32, i32
  }
}

</mosaic_0001>

<bundles_post_ra>
// kernel: random_cutmix.4
= control target key start
LH: loop header
LB: loop body
LE: loop exit
PB: predicated region body
PF: predicated region fallthrough
CT: control target
= control target key end

     0   :  { %s599_s12 = smov 0   ;;  %s601_s13 = smov 0   ;;  %s641_s0 = inlined_call_operand.vmem [shape: s32[1,1,256], index: 0, kind: input, shape index: {}]   ;;  %s642_s1 = inlined_call_operand.vmem [shape: f32[2,4,256], index: 1, kind: input, shape index: {}, may-alias: {1,2}]   ;;  %s643_s2 = inlined_call_operand.vmem [shape: f32[2,4,256], index: 2, kind: input, shape index: {}, may-alias: {1,2}]   ;;  %s644_s3 = inlined_call_operand.vmem [shape: f32[2,4,256], index: 3, kind: output, shape index: {}]  }
   0x1   :  { %s603_s14 = smov 0  }
   0x2 LB: > { %s22_s15 = sadd.s32 1, %s572_s13  ;;  %p512_p0 = scmp.ge.s32.totalorder %s576_s14, 1  ;;  %s576_s14 = sphi %s603_s14, %s13_s14   ;;  %s572_s13 = sphi %s601_s13, %s646_s13   ;;  %s568_s12 = sphi %s599_s12, %s645_s12  }
   0x3   : > { %p23_p1 = scmp.ge.s32.totalorder %s22_s15, 2  ;;  %p237_p2 = scmp.lt.s32.totalorder %s576_s14, 3 }
   0x5   : > { %s648_s15 = smov (%p23_p1, %s22_s15), 0  ;;  %p238_p3 = pnand %p512_p0, %p237_p2 }
   0x6   : > { %p301_p4 = scmp.lt.s32.totalorder (!%p238_p3), %s568_s12, 1  ;;  %s310_s16 = sadd.s32 (!%p238_p3), 1, %s568_s12  ;;  %v361_v0 = vlaneseq (!%p238_p3)  ;;  %v356_v1 = vld [vmem:[%s641_s0] sm:$0x3] (!%p238_p3)  ;;  %v578_v4 = vmov (!%p238_p3), 0  }
   0x7   : > { %241 = sbr.rel (%p238_p3) target bundleno = 30 (0x1e), region = 32  ;;  %p311_p5 = scmp.lt.s32.totalorder (!%p238_p3), %s310_s16, 0  ;;  %vm357_vm0 = vcmp.ne.s32.totalorder (!%p238_p3), %v356_v1, 0 }
   0x8   : > { %s312_s17 = ssub.s32 (!%p238_p3), 0, %s310_s16  ;;  %v362_v2 = vshrl.u32 (!%p238_p3), %v361_v0, 7  ;;  %v360_v5 = vsel (!%p238_p3), %vm357_vm0, 1, %v578_v4 }
   0x9   : > { %s515_s18 = smin.u32 (!%p238_p3), %s312_s17, %s310_s16 }
   0xa   : > { %s314_s21 = sand.u32 (!%p238_p3), 1, %s515_s18   ;;  %v363_v3 = vsub.s32 (!%p238_p3), 0, %v362_v2  ;;  %v367_v6 = vsub.s32 (!%p238_p3), 1, %v362_v2 }
   0xb   : > { %s315_s22 = ssub.s32 (!%p238_p3), 0, %s314_s21 }
   0xc   : > { %v364_v7 = vrot.slane (!%p238_p3), %v360_v5, %v363_v3  ;;  %v368_v9 = vrot.slane (!%p238_p3), %v360_v5, %v367_v6 }
   0xe   : > { %s650_s12 = smov (!%p301_p4, %s568_s12), 1  ;;  %s652_s22 = smov (!%p311_p5, %s315_s22), %s314_s21  ;;  %vm369_vm1 = vcmp.eq.s32.totalorder %v364_v7, 1  ;;  %vm370_vm2 = vcmp.eq.s32.totalorder %v368_v9, 1 }
   0xf   : > { %s524_s23 = sshll.u32 %s650_s12, 3  ;;  %p517_p6 = scmp.lt.s32.totalorder %s652_s22, 0 }
  0x10   : > { %s321_s24 = sadd.s32 2, %s652_s22  ;;  %s308_s27 = scalar_lea.vmem %s642_s1, %s524_s23 }
  0x11   : > { %s654_s24 = smov (!%p517_p6, %s321_s24), %s652_s22  ;;  %v359_v8 = vld [vmem:[%s308_s27] sm:$0xff]  ;;  %s354_s7 = scalar_lea.vmem %s644_s3, %s524_s23 }
  0x12   : > { %p324_p7 = scmp.lt.s32.totalorder %s654_s24, 1  ;;  %v375_v10 = vcombine.high %v359_v8, %v359_v8 }
  0x14   : > { %s656_s24 = smov (!%p324_p7, %s654_s24), 1 }
  0x15   : > { %s525_s28 = sshll.u32 %s656_s24, 3 }
  0x16   : > { %s331_s4 = scalar_lea.vmem %s643_s2, %s525_s28 }
  0x17   : > { %v358_v11 = vld [vmem:[%s331_s4] sm:$0xff] }
  0x18   : > { %v372_v12 = vcombine.high %v358_v11, %v358_v11  ;;  %v377_v13 = vsel %vm369_vm1, %v358_v11, %v359_v8 }
  0x1a   : > { %v378_v14 = vsel %vm370_vm2, %v372_v12, %v375_v10 }
  0x1b   : > { %v381_v15 = vcombine.low %v377_v13, %v378_v14 }
  0x1d   : > { %383 = vst [vmem:[%s354_s7] sm:$0xff] %v381_v15 }
  0x1e PF: > { %s13_s14 = sadd.s32 1, %s576_s14   ;;  %s645_s12 = smov %s572_s13 }
  0x1f   : > { %p10_p8 = scmp.ge.s32.totalorder %s13_s14, 4   ;;  %s646_s13 = smov %s648_s15 }
  0x21   :  { %12 = sbr.rel (!%p10_p8) target bundleno = 2 (0x2), region = 68 }

// kernel: random_cutmix.5
= control target key start
LH: loop header
LB: loop body
LE: loop exit
PB: predicated region body
PF: predicated region fallthrough
CT: control target
= control target key end

     0   :  { %v85_v1 = vmov 0   ;;  %s132_s0 = inlined_call_operand.<no memory space> [shape: f32[1], index: 0, kind: input, shape index: {}]   ;;  %s133_s1 = inlined_call_operand.vmem [shape: s32[2,1], index: 1, kind: input, shape index: {}]   ;;  %s134_s2 = inlined_call_operand.vmem [shape: s32[2,1], index: 2, kind: input, shape index: {}]   ;;  %s135_s3 = inlined_call_operand.hbm [shape: f32[2,10], index: 3, kind: output, shape index: {}]  }
   0x1   :  { %v19_v0 = vld [vmem:[%s133_s1] sm:$0x3]  ;;  %60 = vset.pattern.permute.xlu0 %v85_v1 }
   0x2   :  { %9 = vsyncpa [#allocation4], 0  ;;  %21 = vperm.xlu0 %60, %v19_v0   ;;  %v26_v2 = vld [vmem:[%s134_s2] sm:$0x3]  ;;  %v17_v3 = vlaneseq  ;;  %s35_s18 = ssub.f32 1.0, %s132_s0  ;;  %v33_v6 = vstv %s132_s0  ;;  %v86_v7 = vmov 0.0  }
   0x3   :  { %s87_s1 = smov [#allocation3]   ;;  %vm39_vm2 = vcmask 74752  }
   0x4   :  { %v18_v4 = vand.u32 127, %v17_v3  ;;  %v36_v9 = vstv %s35_s18  ;;  %s47_s2 = sshll.u32 %s87_s1, 4  ;;  %s48_s2 = int_to_ptr.vmem [resolvable:$true] %s47_s2 }
   0x5   :  { %s61_s21 = scalar_lea.vmem %s48_s2, 32  ;;  %p66_p1 = scmp.lt.s32.totalorder %s48_s2, %s48_s2 }
   0x6   :  { %28 = vperm.xlu0 %60, %v26_v2   ;;  %p62_p0 = scmp.ne.s32.totalorder %s48_s2, %s61_s21  ;;  %p67_p2 = scmp.lt.s32.totalorder %s61_s21, %s61_s21 }
   0x8   :  { %p68_p3 = por %p67_p2, %p66_p1 }
   0xa   :  { %p69_p4 = pnand %p68_p3, %p62_p0 }
  0x81   :  { %v22_v5 = vpop.permute.xlu0 %21 }
  0x82   :  { %vm23_vm0 = vcmp.eq.s32.totalorder %v18_v4, %v22_v5 }
  0x83   :  { %v55_v8 = vsel %vm23_vm0, 1.0, %v86_v7 }
  0x84   :  { %v34_v12 = vmul.f32 %v55_v8, %v33_v6 }
  0x85   :  { %v29_v10 = vpop.permute.xlu0 %28 }
  0x86   :  { %vm30_vm1 = vcmp.eq.s32.totalorder %v18_v4, %v29_v10 }
  0x87   :  { %v56_v11 = vsel %vm30_vm1, 1.0, %v86_v7 }
  0x88   :  { %v37_v13 = vmul.f32 %v56_v11, %v36_v9 }
  0x8a   :  { %v38_v14 = vadd.f32 %v37_v13, %v34_v12 }
  0x8c   :  { %40 = vst.msk [vmem:[#allocation3] sm:$0x3] %vm39_vm2, %v38_v14 }
  0x8d   :  { %72 = shalt.err (!%p69_p4)
}
  0x8e   :  { %s73_s23 = scalar_lea.hbm %s135_s3, 32 }
  0x8f   :  { %p74_p5 = scmp.ne.s32.totalorder %s135_s3, %s73_s23  ;;  %p77_p6 = scmp.lt.u32.totalorder %s73_s23, %s135_s3 }
  0x91   :  { %p79_p7 = pnand %p77_p6, %p74_p5 }
  0x93   :  { %82 = shalt.err (!%p79_p7)
}
  0x94   :  { %50 = dma.vmem_to_hbm [thread:$0]  %s48_s2, 32, %s135_s3, [#allocation4]  }
  0x95   :  { %83 = dma.done.wait [#allocation4], 32  }
  0x96   :  { %84 = vsyncadd [#allocation4], 4294967264 }
  0x97   :  { %54 = vsyncpa [#allocation4], 1 }

</bundles_post_ra>
